<compile_context>
chip_gen: v7x
topology: tpu7x:2x2x1
jax: 0.10.0
libtpu: 0.0.40
codegen_flags: <defaults>
</compile_context>

<pallas_src>
from collections import OrderedDict
from functools import partial
from types import SimpleNamespace

import jax
import jax.numpy as jnp
from jax import lax
from jax.experimental import pallas as pl
from jax.experimental.pallas import tpu as pltpu

NUM_SAMPLES = 1
NS_ITERS = 20  # Newton-Schulz iterations for the batched SPD inverse


# ----------------------------------------------------------------------------
# Feature extractor kernel (bf16 MXU, f32 accum, FiLM/ReLU epilogue)
# ----------------------------------------------------------------------------
def _feature_kernel(x_ref, w_ref, b_ref, gamma_ref, beta_ref, o_ref, acc_ref):
    @pl.when(pl.program_id(1) == 0)
    def _init():
        acc_ref[...] = jnp.zeros_like(acc_ref)

    acc_ref[...] += jnp.dot(x_ref[...], w_ref[...],
                            preferred_element_type=jnp.float32)

    @pl.when(pl.program_id(1) == pl.num_programs(1) - 1)
    def _finalize():
        y = acc_ref[...] + b_ref[...]
        y = jnp.maximum(y, 0.0)
        o_ref[...] = (gamma_ref[...] * y + beta_ref[...]).astype(o_ref.dtype)


def _pick_tile(total, candidates):
    for c in candidates:
        if total % c == 0:
            return c
    return total


def feature_extract(x_flat, w_bf, b, gamma, beta):
    """x_flat (N, F) f32, w_bf (Fpad, D) bf16 (pre-padded/cast at init)."""
    n, f = x_flat.shape
    fpad, d = w_bf.shape
    n_extra = (-n) % 16
    if n_extra:
        x_flat = jnp.pad(x_flat, ((0, n_extra), (0, 0)))
    if fpad != f:
        x_flat = jnp.pad(x_flat, ((0, 0), (0, fpad - f)))
    npad = x_flat.shape[0]
    tm = _pick_tile(npad, (256, 128, 64, 32, 16))
    tk = _pick_tile(fpad, (2048, 1024, 512, 256, 128))
    x_bf = x_flat.astype(jnp.bfloat16)

    out = pl.pallas_call(
        _feature_kernel,
        out_shape=jax.ShapeDtypeStruct((npad, d), jnp.float32),
        grid_spec=pltpu.PrefetchScalarGridSpec(
            num_scalar_prefetch=0,
            grid=(npad // tm, fpad // tk),
            in_specs=[
                pl.BlockSpec((tm, tk), lambda i, k: (i, k)),
                pl.BlockSpec((tk, d), lambda i, k: (k, 0)),
                pl.BlockSpec((1, d), lambda i, k: (0, 0)),
                pl.BlockSpec((1, d), lambda i, k: (0, 0)),
                pl.BlockSpec((1, d), lambda i, k: (0, 0)),
            ],
            out_specs=pl.BlockSpec((tm, d), lambda i, k: (i, 0)),
            scratch_shapes=[pltpu.VMEM((tm, d), jnp.float32)],
        ),
        compiler_params=pltpu.CompilerParams(
            dimension_semantics=("parallel", "arbitrary"),
            vmem_limit_bytes=32 * 1024 * 1024),
    )(x_bf, w_bf, b, gamma, beta)
    return out[:n]


# ----------------------------------------------------------------------------
# Fused cluster-parameter + batched Newton-Schulz inverse kernel
# ----------------------------------------------------------------------------
def _make_cluster_kernel(c, d, ns_iters):
    def kernel(xt_ref, pt_ref, mean_ref, sigma0_ref, ctxn_ref, ctxmu_ref,
               ctxm2_ref, mu_ref, pcat_ref, uw_ref, q_ref):
        xt = xt_ref[...]                                    # (Mt, D)
        pt = pt_ref[...]                                    # (Mt, C)
        mt = xt.shape[0]
        xc = xt - mean_ref[...]                             # centered by episode mean

        # per-class soft counts: context (invariant) + target, as a tiny matmul.
        ones_col = jnp.ones((mt, 1), jnp.float32)
        n_col = ctxn_ref[...] + lax.dot_general(
            pt, ones_col, (((0,), (0,)), ((), ())),
            preferred_element_type=jnp.float32)             # (C, 1)
        n_col = jnp.maximum(n_col, 1e-12)                   # guard degenerate classes

        # all class means (centered) from ONE MXU op.
        mu_un = ctxmu_ref[...] + lax.dot_general(
            pt, xc, (((0,), (0,)), ((), ())),
            preferred_element_type=jnp.float32)             # (C, D)
        mu_cent = mu_un / n_col                             # (C, D)

        # all class second moments from ONE MXU op:
        #   W[:, i*D:(i+1)*D] = p[:, i:i+1] * Xc ;  M2 = W^T Xc  -> (C*D, D)
        w_parts = [pt[:, i:i + 1] * xc for i in range(c)]
        w_big = jnp.concatenate(w_parts, axis=1)            # (Mt, C*D)
        m2_flat = lax.dot_general(
            w_big, xc, (((0,), (0,)), ((), ())),
            preferred_element_type=jnp.float32)             # (C*D, D)
        m2 = m2_flat.reshape(c, d, d) + ctxm2_ref[...]      # (C, D, D)

        # shrinkage covariance, vectorized over classes.
        eye = (lax.broadcasted_iota(jnp.int32, (d, d), 0) ==
               lax.broadcasted_iota(jnp.int32, (d, d), 1)).astype(jnp.float32)
        lamb = n_col / (n_col + 1.0)                        # (C, 1)
        inv_n = 1.0 / n_col
        outer = mu_cent[:, :, None] * mu_cent[:, None, :]   # (C, D, D)
        cov = m2 * inv_n[:, :, None] - outer                # (C, D, D)
        # identity_coefficient == 1.0 (as in TransductiveCnaps.__init__)
        s3 = (eye[None, :, :]
              + lamb[:, :, None] * cov
              + (1.0 - lamb)[:, :, None] * sigma0_ref[...][None, :, :])

        # Batched Newton-Schulz inverse (pure MXU work).  S = I + PSD so all
        # eigenvalues >= 1 and a scaled-identity start converges quadratically.
        rowsum = jnp.sum(jnp.abs(s3), axis=2)               # (C, D)
        inv_norm = 1.0 / jnp.max(rowsum, axis=1, keepdims=True)   # (C, 1)
        x0 = eye[None, :, :] * inv_norm[:, :, None]         # (C, D, D)
        two_eye = 2.0 * eye[None, :, :]

        def ns_body(_, xk):
            sx = jnp.einsum('cij,cjk->cik', s3, xk,
                            preferred_element_type=jnp.float32)
            return jnp.einsum('cij,cjk->cik', xk, two_eye - sx,
                              preferred_element_type=jnp.float32)

        prec3 = lax.fori_loop(0, ns_iters, ns_body, x0)     # (C, D, D)

        mu_ref[...] = mu_cent
        # lane-aligned (D, D) block stores -> precision already in the
        # (D, C*D) layout the posterior kernel consumes (no XLA transpose).
        for i in range(c):
            pcat_ref[:, i * d:(i + 1) * d] = prec3[i]

        # P_c mu_c (precision is symmetric by construction) and mu^T P mu.
        u = jnp.sum(prec3 * mu_cent[:, None, :], axis=2)    # (C, D)
        uw_ref[...] = 2.0 * u                               # (C, D)
        ones_row = jnp.ones((1, d), jnp.float32)
        q_ref[...] = lax.dot_general(
            ones_row, mu_cent * u, (((1,), (1,)), ((), ())),
            preferred_element_type=jnp.float32)             # (1, C)
    return kernel


def cluster_and_invert(xt, pt, mean, sigma0, ctx_n, ctx_mu, ctx_m2):
    """Shrinkage class covariances + batched NS inverse, one pallas_call."""
    c = pt.shape[1]
    d = xt.shape[1]
    # TODO(synk): torch.inverse has no Pallas primitive; the SPD inverse is
    # approximated in-kernel by NS_ITERS Newton-Schulz iterations.
    return pl.pallas_call(
        _make_cluster_kernel(c, d, NS_ITERS),
        out_shape=(
            jax.ShapeDtypeStruct((c, d), jnp.float32),        # centered means
            jax.ShapeDtypeStruct((d, c * d), jnp.float32),    # precision, col-blocked
            jax.ShapeDtypeStruct((c, d), jnp.float32),        # 2 * P_c mu_c
            jax.ShapeDtypeStruct((1, c), jnp.float32),        # mu_c^T P_c mu_c
        ),
    )(xt, pt, mean, sigma0, ctx_n, ctx_mu, ctx_m2)


# ----------------------------------------------------------------------------
# Mahalanobis posterior + fused softmax kernel (gridded over M tiles)
# ----------------------------------------------------------------------------
def _make_posterior_kernel(c, d):
    def kernel(x_ref, mean_ref, pcat_ref, uw_ref, q_ref, logits_ref, probs_ref):
        xc = x_ref[...] - mean_ref[...]                     # (tm, D)
        # one lane-dense matmul for all classes: (tm, D) @ (D, C*D)
        t = jnp.dot(xc, pcat_ref[...], preferred_element_type=jnp.float32)
        x_tiled = jnp.concatenate([xc] * c, axis=1)         # (tm, C*D)
        # block-diagonal selector reduces each D-lane block -> one MXU matmul
        r = lax.broadcasted_iota(jnp.int32, (c * d, c), 0) // d
        cidx = lax.broadcasted_iota(jnp.int32, (c * d, c), 1)
        sel = (r == cidx).astype(jnp.float32)               # (C*D, C)
        quad = jnp.dot(t * x_tiled, sel, preferred_element_type=jnp.float32)  # (tm, C)
        # x^T (P + P^T) mu  for all classes: (tm, D) x (C, D) contracted on D
        cross = lax.dot_general(xc, uw_ref[...], (((1,), (1,)), ((), ())),
                                preferred_element_type=jnp.float32)           # (tm, C)
        logits = -(quad - cross + q_ref[...])
        logits_ref[...] = logits

        mx = jnp.max(logits, axis=1, keepdims=True)
        e = jnp.exp(logits - mx)
        denom = jnp.sum(e, axis=1, keepdims=True)
        probs_ref[...] = e / denom
    return kernel


def posterior_softmax(features, mean, pcat, uw, q):
    """Returns (logits, softmax(logits)) in one fused, M-tiled Pallas call."""
    m, d = features.shape
    c = uw.shape[0]
    x = features
    pad = (-m) % 8
    if pad:
        x = jnp.pad(x, ((0, pad), (0, 0)))
    mp = x.shape[0]
    tm = mp if mp <= 256 else 256
    extra = (-mp) % tm
    if extra:
        x = jnp.pad(x, ((0, extra), (0, 0)))
        mp = x.shape[0]

    logits, probs = pl.pallas_call(
        _make_posterior_kernel(c, d),
        out_shape=(
            jax.ShapeDtypeStruct((mp, c), jnp.float32),
            jax.ShapeDtypeStruct((mp, c), jnp.float32),
        ),
        grid_spec=pltpu.PrefetchScalarGridSpec(
            num_scalar_prefetch=0,
            grid=(mp // tm,),
            in_specs=[
                pl.BlockSpec((tm, d), lambda i: (i, 0)),
                pl.BlockSpec((1, d), lambda i: (0, 0)),
                pl.BlockSpec((d, c * d), lambda i: (0, 0)),
                pl.BlockSpec((c, d), lambda i: (0, 0)),
                pl.BlockSpec((1, c), lambda i: (0, 0)),
            ],
            out_specs=[
                pl.BlockSpec((tm, c), lambda i: (i, 0)),
                pl.BlockSpec((tm, c), lambda i: (i, 0)),
            ],
        ),
        compiler_params=pltpu.CompilerParams(
            dimension_semantics=("parallel",)),
    )(x, mean, pcat, uw, q)
    return logits[:m], probs[:m]


def split_first_dim_linear(x, first_two_dims):
    return x.reshape(tuple(first_two_dims) + x.shape[1:])


# ----------------------------------------------------------------------------
# Loop-invariant statistics (computed ONCE per episode, plain JAX glue)
# ----------------------------------------------------------------------------
def _episode_invariants(features):
    n = features.shape[0]
    mean = jnp.mean(features, axis=0, keepdims=True)
    xc = features - mean
    sigma0 = (xc.T @ xc) / float(max(n - 1, 1))
    return mean, sigma0


def _context_class_stats(ctx_features, ctx_probs, mean):
    n, d = ctx_features.shape
    c = ctx_probs.shape[1]
    xc = ctx_features - mean
    n_col = jnp.sum(ctx_probs, axis=0)[:, None]                       # (C, 1)
    mu_un = ctx_probs.T @ xc                                          # (C, D)
    w = (ctx_probs[:, :, None] * xc[:, None, :]).reshape(n, c * d)
    m2 = (w.T @ xc).reshape(c, d, d)                                  # (C, D, D)
    return n_col, mu_un, m2


def _zero_class_stats(c, d):
    return (jnp.zeros((c, 1), jnp.float32),
            jnp.zeros((c, d), jnp.float32),
            jnp.zeros((c, d, d), jnp.float32))


# ----------------------------------------------------------------------------
# Jitted episode tails (refinement loop with no host syncs)
# ----------------------------------------------------------------------------
def _refine_loop(target_features, mean, sigma0, ctx_n, ctx_mu, ctx_m2,
                 init_logits, init_probs, init_mu_cent, init_pcat,
                 max_steps, min_steps):
    def body(carry):
        step, logits, probs, _mu, _pcat, done = carry
        mu_cent, pcat, uw, q = cluster_and_invert(
            target_features, probs, mean, sigma0, ctx_n, ctx_mu, ctx_m2)
        new_logits, new_probs = posterior_softmax(target_features, mean, pcat, uw, q)
        delta = jnp.sum(jnp.argmax(logits, axis=1) != jnp.argmax(new_logits, axis=1))
        new_done = jnp.logical_and(step >= min_steps - 1, delta == 0)
        return (step + 1, new_logits, new_probs, mu_cent, pcat, new_done)

    def cond(carry):
        step = carry[0]
        done = carry[-1]
        return jnp.logical_and(step < max_steps, jnp.logical_not(done))

    carry = (jnp.int32(0), init_logits, init_probs, init_mu_cent, init_pcat,
             jnp.bool_(False))
    carry = lax.while_loop(cond, body, carry)
    return carry[1], carry[3], carry[4]


@partial(jax.jit, static_argnames=("max_steps", "min_steps"))
def _context_episode(context_features, context_probs, target_features, *,
                     max_steps, min_steps):
    c = context_probs.shape[1]
    d = context_features.shape[1]

    # initial estimate from context only (matches estimate_cluster_parameters)
    mean_ctx, sigma0_ctx = _episode_invariants(context_features)
    z_n, z_mu, z_m2 = _zero_class_stats(c, d)
    mu_cent, pcat, uw, q = cluster_and_invert(
        context_features, context_probs, mean_ctx, sigma0_ctx, z_n, z_mu, z_m2)
    logits, probs = posterior_softmax(target_features, mean_ctx, pcat, uw, q)
    mu = mu_cent + mean_ctx

    if max_steps > 0:
        all_features = jnp.concatenate([context_features, target_features], axis=0)
        mean_all, sigma0_all = _episode_invariants(all_features)
        ctx_n, ctx_mu, ctx_m2 = _context_class_stats(
            context_features, context_probs, mean_all)
        logits, mu_cent, pcat = _refine_loop(
            target_features, mean_all, sigma0_all, ctx_n, ctx_mu, ctx_m2,
            logits, probs, mu_cent, pcat, max_steps, min_steps)
        mu = mu_cent + mean_all

    prec = jnp.transpose(pcat.reshape(d, c, d), (1, 0, 2))
    return logits, mu, prec


@partial(jax.jit, static_argnames=("max_steps", "min_steps"))
def _target_only_episode(target_features, mu_stored, prec_stored, *,
                         max_steps, min_steps):
    c, d = mu_stored.shape
    mean0 = jnp.zeros((1, d), jnp.float32)
    pcat = jnp.transpose(prec_stored, (1, 0, 2)).reshape(d, c * d)
    u = jnp.einsum('cij,cj->ci', prec_stored, mu_stored)
    w = jnp.einsum('cij,ci->cj', prec_stored, mu_stored)
    uw = u + w
    q = jnp.sum(mu_stored * u, axis=1)[None, :]
    logits, probs = posterior_softmax(target_features, mean0, pcat, uw, q)

    mu_out, prec_out = mu_stored, prec_stored
    if max_steps > 0:
        mean_t, sigma0_t = _episode_invariants(target_features)
        z_n, z_mu, z_m2 = _zero_class_stats(c, d)
        logits, mu_cent, pcat = _refine_loop(
            target_features, mean_t, sigma0_t, z_n, z_mu, z_m2,
            logits, probs, mu_stored - mean_t, pcat, max_steps, min_steps)
        mu_out = mu_cent + mean_t
        prec_out = jnp.transpose(pcat.reshape(d, c, d), (1, 0, 2))
    return logits, mu_out, prec_out


# ----------------------------------------------------------------------------
# Model
# ----------------------------------------------------------------------------
class TransductiveCnapsPallas:
    def __init__(self, args, image_shape=(3, 16, 16), feature_dim=128,
                 task_rep_dim=128, cluster_refinement_param_mode='test',
                 seed=0):
        self.args = args
        self.cluster_refinement_param_mode = cluster_refinement_param_mode
        self.identity_coefficient = 1.0
        self.task_representation = None
        self.class_means = OrderedDict()
        self.class_precisions = OrderedDict()
        self.task_counter = 0.0

        c, h, w = image_shape
        f = c * h * w
        d = feature_dim
        r = task_rep_dim
        self.feature_dim = d

        # TODO(synk): the original ConfigureNetworks builds a FiLM-ResNet18
        # feature extractor + deep-set task encoder; here they are replaced by
        # deterministic linear/FiLM stand-ins (no checkpoint is loaded).
        keys = jax.random.split(jax.random.PRNGKey(seed), 4)
        scale = 0.05
        fe_w = (scale * jax.random.normal(keys[0], (f, d))).astype(jnp.float32)
        self.fe_b = jnp.zeros((1, d), jnp.float32)
        self.enc_w = (scale * jax.random.normal(keys[1], (f, r))).astype(jnp.float32)
        self.enc_b = jnp.zeros((1, r), jnp.float32)
        self.gamma_w = (scale * jax.random.normal(keys[2], (r, d))).astype(jnp.float32)
        self.gamma_b = jnp.ones((1, d), jnp.float32)
        self.beta_w = (scale * jax.random.normal(keys[3], (r, d))).astype(jnp.float32)
        self.beta_b = jnp.zeros((1, d), jnp.float32)

        # pad + cast the feature-extractor weight ONCE (reused every forward)
        f_pad = (-f) % 128
        if f_pad:
            fe_w = jnp.pad(fe_w, ((0, f_pad), (0, 0)))
        self.fe_w_bf = fe_w.astype(jnp.bfloat16)

    # ---- sub-network stand-ins (glue, plain JAX) ----
    @staticmethod
    def _flatten(images):
        # NCHW -> (N, C*H*W), row-major (matches torch .view semantics)
        return images.reshape(images.shape[0], -1).astype(jnp.float32)

    def set_encoder(self, context_images, context_probs, target_images):
        all_flat = jnp.concatenate(
            [self._flatten(context_images), self._flatten(target_images)], axis=0)
        pooled = jnp.mean(all_flat, axis=0, keepdims=True)          # (1, F)
        del context_probs  # stand-in encoder ignores the soft labels
        return jnp.dot(pooled, self.enc_w) + self.enc_b             # (1, R)

    def feature_adaptation_network(self, task_representation):
        gamma = jnp.dot(task_representation, self.gamma_w) + self.gamma_b
        beta = jnp.dot(task_representation, self.beta_w) + self.beta_b
        return gamma, beta

    def _get_features(self, context_images, target_images):
        gamma, beta = self.feature_adaptation_network(self.task_representation)
        ctx_flat = self._flatten(context_images)
        tgt_flat = self._flatten(target_images)
        # single extractor pass over concat(context, target): weight streamed once
        all_flat = jnp.concatenate([ctx_flat, tgt_flat], axis=0)
        feats = feature_extract(all_flat, self.fe_w_bf, self.fe_b, gamma, beta)
        n_ctx = ctx_flat.shape[0]
        return feats[:n_ctx], feats[n_ctx:]

    def _get_target_features(self, target_images):
        gamma, beta = self.feature_adaptation_network(self.task_representation)
        return feature_extract(self._flatten(target_images), self.fe_w_bf,
                               self.fe_b, gamma, beta)

    def _store_class_params(self, mu, prec, label_set):
        for index, label in enumerate(label_set):
            self.class_means[label] = mu[index]
            self.class_precisions[label] = prec[index]

    def _stack_class_params(self, label_set):
        mu = jnp.stack([self.class_means[l] for l in label_set])
        prec = jnp.stack([self.class_precisions[l] for l in label_set])
        return mu, prec

    # ---- forward ----
    def forward(self, context_images, context_labels, target_images, label_set):
        num_classes = len(label_set)

        if context_images is None and context_labels is None:
            target_features = self._get_target_features(target_images)
            mu, prec = self._stack_class_params(label_set)
            max_steps = self.args.max_cluster_refinement_steps_test
            min_steps = self.args.min_cluster_refinement_steps_test
            target_logits, mu, prec = _target_only_episode(
                target_features, mu, prec, max_steps=max_steps, min_steps=min_steps)
            if max_steps > 0:
                self._store_class_params(mu, prec, label_set)
            return split_first_dim_linear(target_logits,
                                          [NUM_SAMPLES, target_images.shape[0]])

        # one-hot context probabilities built fully on device (no host readback)
        label_arr = jnp.asarray(label_set, dtype=jnp.int32)
        mapped = jnp.argmax(context_labels.astype(jnp.int32)[:, None] == label_arr[None, :],
                            axis=1)
        context_probs = jax.nn.one_hot(mapped, num_classes, dtype=jnp.float32)

        strategy = self.args.continual_learning_strategy
        if strategy == 'moving-encoding':
            self.task_representation = self.set_encoder(
                context_images, context_probs, target_images)
        elif strategy == 'first-encoding':
            if self.task_counter == 0:
                self.task_representation = self.set_encoder(
                    context_images, context_probs, target_images)
        elif strategy == 'averaging-encoding':
            if self.task_counter == 0:
                self.task_representation = self.set_encoder(
                    context_images, context_probs, target_images)
            else:
                ratio = self.task_counter / (self.task_counter + 1.0)
                self.task_representation = (
                    ratio * self.task_representation
                    + (1 - ratio) * self.set_encoder(context_images, context_probs,
                                                     target_images))
        else:
            raise Exception("Unknown continual learning strategy encountered.")
        self.task_counter += 1.0

        context_features, target_features = self._get_features(context_images,
                                                               target_images)

        if self.cluster_refinement_param_mode == 'train':
            max_steps = self.args.max_cluster_refinement_steps_train
            min_steps = self.args.min_cluster_refinement_steps_train
        elif self.cluster_refinement_param_mode == 'test':
            max_steps = self.args.max_cluster_refinement_steps_test
            min_steps = self.args.min_cluster_refinement_steps_test
        else:
            raise Exception("Incorrect model mode has been set.")

        target_logits, mu, prec = _context_episode(
            context_features, context_probs, target_features,
            max_steps=max_steps, min_steps=min_steps)
        self._store_class_params(mu, prec, label_set)

        return split_first_dim_linear(target_logits,
                                      [NUM_SAMPLES, target_images.shape[0]])


# ----------------------------------------------------------------------------
# Demo
# ----------------------------------------------------------------------------
if __name__ == "__main__":
    args = SimpleNamespace(
        continual_learning_strategy='moving-encoding',
        feature_adaptation='film',
        pretrained_resnet_path=None,
        max_cluster_refinement_steps_test=2,
        min_cluster_refinement_steps_test=1,
        max_cluster_refinement_steps_train=2,
        min_cluster_refinement_steps_train=1,
    )

    key = jax.random.PRNGKey(0)
    k_ctx, k_tgt = jax.random.split(key)
    n_context, n_target = 16, 16
    image_shape = (3, 16, 16)
    label_set = [0, 1, 2, 3]

    context_images = jax.random.normal(k_ctx, (n_context,) + image_shape, jnp.float32)
    target_images = jax.random.normal(k_tgt, (n_target,) + image_shape, jnp.float32)
    context_labels = jnp.repeat(jnp.arange(4, dtype=jnp.int32), n_context // 4)

    model = TransductiveCnapsPallas(args, image_shape=image_shape,
                                    feature_dim=128, task_rep_dim=128,
                                    cluster_refinement_param_mode='test', seed=0)

    logits = model.forward(context_images, context_labels, target_images, label_set)
    logits = jax.block_until_ready(logits)

    assert logits.shape == (NUM_SAMPLES, n_target, len(label_set)), logits.shape
    assert logits.dtype == jnp.float32
    assert bool(jnp.all(jnp.isfinite(logits)))
    print("KERNEL_OK")
</pallas_src>

<mosaic_0001>
module attributes {stable_mosaic.version = 11 : i64} {
  func.func @_feature_kernel(%arg0: i32, %arg1: i32, %arg2: memref<32x256xbf16, #tpu.memory_space<vmem>>, %arg3: memref<256x128xbf16, #tpu.memory_space<vmem>>, %arg4: memref<1x128xf32, #tpu.memory_space<vmem>>, %arg5: memref<1x128xf32, #tpu.memory_space<vmem>>, %arg6: memref<1x128xf32, #tpu.memory_space<vmem>>, %arg7: memref<32x128xf32, #tpu.memory_space<vmem>>, %arg8: memref<32x128xf32, #tpu.memory_space<vmem>>) attributes {dimension_semantics = [#tpu.dimension_semantics<parallel>, #tpu.dimension_semantics<arbitrary>], iteration_bounds = array<i64: 1, 3>, scalar_prefetch = 0 : i64, scratch_operands = 1 : i64, tpu.core_type = #tpu.core_type<tc>, window_params = [{transform_indices = @transform_0, window_bounds = array<i64: 32, 256>}, {transform_indices = @transform_1, window_bounds = array<i64: 256, 128>}, {pipeline_mode = #tpu.pipeline_mode<synchronous>, transform_indices = @transform_2, window_bounds = array<i64: 1, 128>}, {pipeline_mode = #tpu.pipeline_mode<synchronous>, transform_indices = @transform_3, window_bounds = array<i64: 1, 128>}, {pipeline_mode = #tpu.pipeline_mode<synchronous>, transform_indices = @transform_4, window_bounds = array<i64: 1, 128>}, {transform_indices = @transform_5, window_bounds = array<i64: 32, 128>}]} {
    %c0_i32 = arith.constant 0 : i32
    %0 = arith.cmpi eq, %arg1, %c0_i32 : i32
    %1 = arith.extui %0 : i1 to i32
    %c0_i32_0 = arith.constant 0 : i32
    %2 = arith.cmpi ne, %1, %c0_i32_0 : i32
    scf.if %2 {
      %cst_9 = arith.constant 0.000000e+00 : f32
      %12 = vector.broadcast %cst_9 : f32 to vector<32x128xf32>
      %c0_10 = arith.constant 0 : index
      %c0_11 = arith.constant 0 : index
      %13 = vector.load %arg8[%c0_10, %c0_11] : memref<32x128xf32, #tpu.memory_space<vmem>>, vector<32x128xf32>
      tpu.vector_store %arg8[%c0_10, %c0_11], %12 {strides = array<i32>} : memref<32x128xf32, #tpu.memory_space<vmem>>, vector<32x128xf32>,
    } else {
    }
    %c0 = arith.constant 0 : index
    %c0_1 = arith.constant 0 : index
    %3 = vector.load %arg8[%c0, %c0_1] : memref<32x128xf32, #tpu.memory_space<vmem>>, vector<32x128xf32>
    %c0_2 = arith.constant 0 : index
    %c0_3 = arith.constant 0 : index
    %4 = vector.load %arg2[%c0_2, %c0_3] : memref<32x256xbf16, #tpu.memory_space<vmem>>, vector<32x256xbf16>
    %c0_4 = arith.constant 0 : index
    %c0_5 = arith.constant 0 : index
    %5 = vector.load %arg3[%c0_4, %c0_5] : memref<256x128xbf16, #tpu.memory_space<vmem>>, vector<256x128xbf16>
    %cst = arith.constant dense<0.000000e+00> : vector<32x128xf32>
    %6 = tpu.matmul %4, %5, %cst {dimension_numbers = #tpu.dot_dimension_numbers<[1], [0], [0], [1], [0, 0, 1, 1], [], []>} : vector<32x256xbf16>, vector<256x128xbf16>, vector<32x128xf32> -> vector<32x128xf32>
    %7 = arith.addf %3, %6 : vector<32x128xf32>
    %c0_6 = arith.constant 0 : index
    %c0_7 = arith.constant 0 : index
    %8 = vector.load %arg8[%c0_6, %c0_7] : memref<32x128xf32, #tpu.memory_space<vmem>>, vector<32x128xf32>
    tpu.vector_store %arg8[%c0_6, %c0_7], %7 {strides = array<i32>} : memref<32x128xf32, #tpu.memory_space<vmem>>, vector<32x128xf32>,
    %c2_i32 = arith.constant 2 : i32
    %9 = arith.cmpi eq, %arg1, %c2_i32 : i32
    %10 = arith.extui %9 : i1 to i32
    %c0_i32_8 = arith.constant 0 : i32
    %11 = arith.cmpi ne, %10, %c0_i32_8 : i32
    scf.if %11 {
      %c0_9 = arith.constant 0 : index
      %c0_10 = arith.constant 0 : index
      %12 = vector.load %arg8[%c0_9, %c0_10] : memref<32x128xf32, #tpu.memory_space<vmem>>, vector<32x128xf32>
      %c0_11 = arith.constant 0 : index
      %c0_12 = arith.constant 0 : index
      %13 = vector.load %arg4[%c0_11, %c0_12] : memref<1x128xf32, #tpu.memory_space<vmem>>, vector<1x128xf32>
      %14 = vector.broadcast %13 : vector<1x128xf32> to vector<32x128xf32>
      %15 = arith.addf %12, %14 : vector<32x128xf32>
      %cst_13 = arith.constant 0.000000e+00 : f32
      %16 = vector.broadcast %cst_13 : f32 to vector<32x128xf32>
      %17 = arith.maximumf %15, %16 : vector<32x128xf32>
      %c0_14 = arith.constant 0 : index
      %c0_15 = arith.constant 0 : index
      %18 = vector.load %arg5[%c0_14, %c0_15] : memref<1x128xf32, #tpu.memory_space<vmem>>, vector<1x128xf32>
      %19 = vector.broadcast %18 : vector<1x128xf32> to vector<32x128xf32>
      %20 = arith.mulf %19, %17 : vector<32x128xf32>
      %c0_16 = arith.constant 0 : index
      %c0_17 = arith.constant 0 : index
      %21 = vector.load %arg6[%c0_16, %c0_17] : memref<1x128xf32, #tpu.memory_space<vmem>>, vector<1x128xf32>
      %22 = vector.broadcast %21 : vector<1x128xf32> to vector<32x128xf32>
      %23 = arith.addf %20, %22 : vector<32x128xf32>
      %c0_18 = arith.constant 0 : index
      %c0_19 = arith.constant 0 : index
      %24 = vector.load %arg7[%c0_18, %c0_19] : memref<32x128xf32, #tpu.memory_space<vmem>>, vector<32x128xf32>
      tpu.vector_store %arg7[%c0_18, %c0_19], %23 {strides = array<i32>} : memref<32x128xf32, #tpu.memory_space<vmem>>, vector<32x128xf32>,
    } else {
    }
    return
  }
  func.func @transform_0(%arg0: i32, %arg1: i32) -> (i32, i32) {
    %c0_i32 = arith.constant 0 : i32
    return %arg0, %arg1 : i32, i32
  }
  func.func @transform_1(%arg0: i32, %arg1: i32) -> (i32, i32) {
    %c0_i32 = arith.constant 0 : i32
    %c0_i32_0 = arith.constant 0 : i32
    return %arg1, %c0_i32 : i32, i32
  }
  func.func @transform_2(%arg0: i32, %arg1: i32) -> (i32, i32) {
    %c0_i32 = arith.constant 0 : i32
    %c0_i32_0 = arith.constant 0 : i32
    %c0_i32_1 = arith.constant 0 : i32
    return %c0_i32, %c0_i32_0 : i32, i32
  }
  func.func @transform_3(%arg0: i32, %arg1: i32) -> (i32, i32) {
    %c0_i32 = arith.constant 0 : i32
    %c0_i32_0 = arith.constant 0 : i32
    %c0_i32_1 = arith.constant 0 : i32
    return %c0_i32, %c0_i32_0 : i32, i32
  }
  func.func @transform_4(%arg0: i32, %arg1: i32) -> (i32, i32) {
    %c0_i32 = arith.constant 0 : i32
    %c0_i32_0 = arith.constant 0 : i32
    %c0_i32_1 = arith.constant 0 : i32
    return %c0_i32, %c0_i32_0 : i32, i32
  }
  func.func @transform_5(%arg0: i32, %arg1: i32) -> (i32, i32) {
    %c0_i32 = arith.constant 0 : i32
    %c0_i32_0 = arith.constant 0 : i32
    return %arg0, %c0_i32 : i32, i32
  }
}

</mosaic_0001>

<bundles_post_ra>
// kernel: tpu_custom_call.1
= control target key start
LH: loop header
LB: loop body
LE: loop exit
PB: predicated region body
PF: predicated region fallthrough
CT: control target
= control target key end

     0   :  { %10 = vsyncpa [#allocation4], 0  ;;  %s1272_s0 = inlined_call_operand.hbm [shape: bf16[32,768], index: 0, kind: input, shape index: {}]   ;;  %s1273_s1 = inlined_call_operand.hbm [shape: bf16[768,128], index: 1, kind: input, shape index: {}]   ;;  %s1274_s2 = inlined_call_operand.vmem [shape: f32[1,128], index: 2, kind: input, shape index: {}]   ;;  %s1275_s3 = inlined_call_operand.vmem [shape: f32[1,128], index: 3, kind: input, shape index: {}]   ;;  %s1276_s4 = inlined_call_operand.vmem [shape: f32[1,128], index: 4, kind: input, shape index: {}]   ;;  %s1277_s5 = inlined_call_operand.hbm [shape: f32[32,128], index: 5, kind: output, shape index: {}]  }
   0x1   :  { %12 = vsyncpa [#allocation4 + $0x1], 0 }
   0x2   :  { %13 = vsyncpa [#allocation7], 0 }
   0x3   :  { %15 = vsyncpa [#allocation7 + $0x1], 0 }
   0x4   :  { %16 = vsyncpa [#allocation5], 0  ;;  %s1038_s18 = smov 0   ;;  %s1040_s19 = smov 0  }
   0x5   :  { %s1042_s20 = smov 0   ;;  %s1044_s21 = smov 0  }
   0x6   :  { %s1046_s22 = smov 0   ;;  %s1048_s23 = smov 0  }
   0x7 LB: > { %s667_s24 = sadd.s32 4294967295, %s995_s23   ;;  %s31_s25 = sadd.s32 1, %s991_s22  ;;  %s995_s23 = sphi %s1048_s23, %s22_s23   ;;  %s991_s22 = sphi %s1046_s22, %s1290_s22   ;;  %s987_s21 = sphi %s1044_s21, %s1289_s21   ;;  %s983_s20 = sphi %s1042_s20, %s1288_s20   ;;  %s979_s19 = sphi %s1040_s19, %s1287_s19   ;;  %s975_s18 = sphi %s1038_s18, %s1286_s18  }
   0x8   : > { %p32_p0 = scmp.ge.s32.totalorder %s31_s25, 3  ;;  %s43_s26 = sadd.s32 1, %s983_s20 }
   0x9   : > { %p50_p1 = scmp.ne.s32.totalorder %s983_s20, %s979_s19  ;;  %p51_p2 = scmp.eq.s32.totalorder %s995_s23, 0 }
   0xa   : > { %s1292_s25 = smov (%p32_p0, %s31_s25), 0  ;;  %p56_p4 = scmp.ne.s32.totalorder %s979_s19, %s975_s18 }
   0xb   : > { %p1074_p3 = por %p51_p2, %p50_p1  ;;  %s39_s28 = ssub.s32 %s991_s22, %s1292_s25 }
   0xc   : > { %p57_p5 = scmp.eq.s32.totalorder %s667_s24, 0  ;;  %p41_p6 = scmp.eq.s32.totalorder %s39_s28, 0 }
   0xd   : > { %p769_p8 = scmp.lt.s32.totalorder %s995_s23, 3  ;;  %s1092_s6 = sand.u32 1, %s983_s20  }
   0xe   : > { %p1083_p7 = por %p57_p5, %p56_p4  ;;  %s708_s7 = sshll.u32 %s991_s22, 7 }
   0xf   : > { %s1089_s30 = scalar_select %p41_p6, %s983_s20, %s43_s26  }
  0x10   : > { %s1280_s29 = scalar_select %p1083_p7, 1, 0 }
  0x11   : > { %s670_s8 = sshll.u32 %s1092_s6, 5  ;;  %s1099_s11 = scalar_lea.hbm %s1272_s0, %s708_s7 }
  0x12   : > { %s208_s12 = scalar_lea.vmem [#allocation3], %s670_s8  ;;  %p1103_p9 = pnand %p769_p8, %p1074_p3 }
  0x13   : > { %s218_s13 = sshll.u32 %s208_s12, 4  ;;  %s205_s15 = scalar_lea.sflag [#allocation4], %s1092_s6  ;;  %s1107_s13 = int_to_ptr.vmem [resolvable:$true] %s218_s13 }
  0x14   : > { %s851_s16 = scalar_lea.hbm %s1099_s11, 512  ;;  %p853_p12 = pneg %p1103_p9 }
  0x15   : > { %p852_p11 = scmp.ne.s32.totalorder %s1099_s11, %s851_s16  ;;  %s856_s26 = scalar_lea.hbm %s1272_s0, 1536 }
  0x16   : > { %p857_p1 = scmp.lt.u32.totalorder %s1099_s11, %s1272_s0  ;;  %p858_p2 = scmp.lt.u32.totalorder %s856_s26, %s851_s16 }
  0x17   : > { %p854_p13 = pnand %p853_p12, %p852_p11  ;;  %p860_p4 = scmp.lt.u32.totalorder %s851_s16, %s1099_s11 }
  0x18   : > { %p859_p3 = por %p858_p2, %p857_p1 }
  0x19   : > { %p855_p0 = pneg %p854_p13 }
  0x1a   : > { %p861_p5 = por %p860_p4, %p859_p3 }
  0x1c   : > { %p862_p6 = pnand %p861_p5, %p855_p0 }
  0x1e   : > { %865 = shalt.err (!%p862_p6)
}
  0x1f   : > { %s866_s7 = scalar_lea.vmem %s1107_s13, 512  ;;  %s997_s8 = smov [#allocation3]  }
  0x20   : > { %p867_p8 = scmp.ne.s32.totalorder %s1107_s13, %s866_s7  ;;  %s871_s9 = sshll.u32 %s997_s8, 4  ;;  %s872_s9 = int_to_ptr.vmem [resolvable:$false] %s871_s9 }
  0x21   : > { %s873_s10 = scalar_lea.vmem %s872_s9, 1024  ;;  %p874_p10 = scmp.lt.s32.totalorder %s1107_s13, %s872_s9 }
  0x22   : > { %p869_p11 = pnand %p867_p8, %p853_p12  ;;  %p875_p1 = scmp.lt.s32.totalorder %s873_s10, %s866_s7 }
  0x24   : > { %p870_p13 = pneg %p869_p11  ;;  %p876_p2 = por %p875_p1, %p874_p10 }
  0x26   : > { %p877_p3 = pnand %p876_p2, %p870_p13 }
  0x28   : > { %880 = shalt.err (!%p877_p3)
}
  0x29   : > { %s998_s12 = smov 384   ;;  %s999_s16 = smov 128  }
  0x2a   : > { %s1000_s17 = smov 8   ;;  %p247_p0 = scmp.lt.s32.totalorder %s995_s23, 4 }
  0x2b   : > { %765 = dma.hbm_to_vmem [thread:$0]  (!%p1103_p9), %s1099_s11, 512, %s1107_s13, %s205_s15, %s998_s12, %s999_s16, %s1000_s17  }
  0x2c   : > { %s673_s18 = sshll.u32 %s1092_s6, 7  ;;  %s709_s26 = sshll.u32 %s991_s22, 11 }
  0x2d   : > { %p1282_p10 = scmp.ge.s32.totalorder %s995_s23, 1  ;;  %s1150_s8 = scalar_lea.hbm %s1273_s1, %s709_s26 }
  0x2e   : > { %s232_s9 = scalar_lea.vmem [#allocation6], %s673_s18  ;;  %s229_s11 = scalar_lea.sflag [#allocation7], %s1092_s6 }
  0x2f   : > { %p1143_p4 = pnand %p1282_p10, %p247_p0  ;;  %s239_s10 = sshll.u32 %s232_s9, 4  ;;  %s1152_s10 = int_to_ptr.vmem [resolvable:$true] %s239_s10 }
  0x30   : > { %s881_s13 = scalar_lea.hbm %s1150_s8, 2048  ;;  %s886_s16 = scalar_lea.hbm %s1273_s1, 6144 }
  0x31   : > { %p882_p5 = scmp.ne.s32.totalorder %s1150_s8, %s881_s13  ;;  %p887_p11 = scmp.lt.u32.totalorder %s1150_s8, %s1273_s1 }
  0x32   : > { %p888_p13 = scmp.lt.u32.totalorder %s886_s16, %s881_s13  ;;  %p890_p2 = scmp.lt.u32.totalorder %s881_s13, %s1150_s8 }
  0x33   : > { %p884_p6 = pnand %p882_p5, %p853_p12 }
  0x34   : > { %p889_p1 = por %p888_p13, %p887_p11 }
  0x35   : > { %p885_p8 = pneg %p884_p6 }
  0x36   : > { %p891_p3 = por %p890_p2, %p889_p1 }
  0x38   : > { %p892_p0 = pnand %p891_p3, %p885_p8 }
  0x3a   : > { %895 = shalt.err (!%p892_p0)
}
  0x3b   : > { %s896_s18 = scalar_lea.vmem %s1152_s10, 2048  ;;  %s1001_s28 = smov [#allocation6]  }
  0x3c   : > { %p897_p10 = scmp.ne.s32.totalorder %s1152_s10, %s896_s18  ;;  %s901_s7 = sshll.u32 %s1001_s28, 4  ;;  %s902_s7 = int_to_ptr.vmem [resolvable:$false] %s901_s7 }
  0x3d   : > { %s903_s9 = scalar_lea.vmem %s902_s7, 4096  ;;  %p904_p7 = scmp.lt.s32.totalorder %s1152_s10, %s902_s7 }
  0x3e   : > { %p899_p5 = pnand %p897_p10, %p853_p12  ;;  %p905_p11 = scmp.lt.s32.totalorder %s903_s9, %s896_s18 }
  0x40   : > { %p900_p6 = pneg %p899_p5  ;;  %p906_p13 = por %p905_p11, %p904_p7 }
  0x42   : > { %p907_p1 = pnand %p906_p13, %p900_p6 }
  0x44   : > { %910 = shalt.err (!%p907_p1)
}
  0x45   : > { %s1002_s13 = smov 64   ;;  %s1003_s15 = smov 4  }
  0x46   : > { %768 = dma.hbm_to_vmem [thread:$0]  (!%p1103_p9), %s1150_s8, 2048, %s1152_s10, %s229_s11, %s1002_s13, %s1002_s13, %s1003_s15  }
  0x47   : > { %251 = sbr.rel (%p1143_p4) target bundleno = 386 (0x182), region = 40  ;;  %s253_s12 = sand.u32 (!%p1143_p4), 1, %s979_s19  }
  0x48   : > { %s677_s16 = sshll.u32 (!%p1143_p4), %s253_s12, 5  ;;  %s254_s17 = scalar_lea.sflag (!%p1143_p4), [#allocation4], %s253_s12 }
  0x49   : > { %s1183_s26 = scalar_lea.vmem (!%p1143_p4), [#allocation3], %s677_s16  ;;  %p1284_p7 = scmp.ne.s32.totalorder (!%p1143_p4), %s1280_s29, 0 }
  0x4e   : > { %962 = dma.done.wait (%p1284_p7), %s254_s17, 512  }
  0x4f   : > { %964 = vsyncadd (%p1284_p7), %s254_s17, 4294966784  ;;  %s678_s18 = sshll.u32 %s253_s12, 7  ;;  %s263_s14 = scalar_lea.sflag [#allocation7], %s253_s12 }
  0x50   : > { %s1189_s6 = scalar_lea.vmem [#allocation6], %s678_s18 }
  0x51   : > { %966 = dma.done.wait (%p1284_p7), %s263_s14, 2048  }
  0x52   : > { %968 = vsyncadd (%p1284_p7), %s263_s14, 4294965248  ;;  %p679_p9 = scmp.ne.s32.totalorder %s987_s21, 0 }
  0x53   : > { %v1004_v0 = vmov (!%p679_p9), 0.0  }
  0x54   : > { %301 = sbr.rel (%p679_p9) target bundleno = 91 (0x5b), region = 52  ;;  %302 = vst [vmem:[#allocation2] sm:$0xff] (!%p679_p9), %v1004_v0  ;;  %303 = vst [vmem:[#allocation2 + $0x8] sm:$0xff] (!%p679_p9), %v1004_v0 }
  0x55   : > { %304 = vst [vmem:[#allocation2 + $0x10] sm:$0xff] (!%p679_p9), %v1004_v0  ;;  %305 = vst [vmem:[#allocation2 + $0x18] sm:$0xff] (!%p679_p9), %v1004_v0 }
  0x5b PF: > { %v829_v1 = vld [vmem:[%s1189_s6 + $0x40] sm:$0xff]   ;;  %v831_v3 = vld [vmem:[%s1189_s6 + $0x48] sm:$0xff]   ;;  %v833_v5 = vld [vmem:[%s1189_s6 + $0x50] sm:$0xff]   ;;  %p700_p12 = scmp.ne.s32.totalorder %s987_s21, 2 }
  0x5c   : > { %v830_v2 = vld [vmem:[%s1189_s6] sm:$0xff]   ;;  %710 = vmatprep.subr.bf16.mxu0 %v829_v1  ;;  %738 = vmatprep.subr.bf16.mxu1 %v829_v1  ;;  %v832_v4 = vld [vmem:[%s1189_s6 + $0x8] sm:$0xff]   ;;  %v834_v6 = vld [vmem:[%s1189_s6 + $0x10] sm:$0xff]  }
  0x5d   : > { %711 = vmatpush3.bf16.msra.mxu0 %v830_v2  ;;  %746 = vmatpush3.bf16.msra.mxu1 %v830_v2  ;;  %v835_v7 = vld [vmem:[%s1189_s6 + $0x58] sm:$0xff]   ;;  %v837_v9 = vld [vmem:[%s1189_s6 + $0x60] sm:$0xff]   ;;  %v839_v11 = vld [vmem:[%s1189_s6 + $0x68] sm:$0xff]  }
  0x5e   : > { %712 = vmatprep.subr.bf16.mxu0 %v831_v3  ;;  %739 = vmatprep.subr.bf16.mxu1 %v831_v3  ;;  %v836_v8 = vld [vmem:[%s1189_s6 + $0x18] sm:$0xff]   ;;  %v838_v10 = vld [vmem:[%s1189_s6 + $0x20] sm:$0xff]   ;;  %v840_v14 = vld [vmem:[%s1189_s6 + $0x28] sm:$0xff]  }
  0x5f   : > { %v847_v12 = vld [vmem:[%s1183_s26 + $0x4] ss:$8 sps:$4 sm:$0xff]   ;;  %v850_v13 = vld [vmem:[%s1183_s26 + $0x14] ss:$8 sps:$4 sm:$0xff]   ;;  %v845_v19 = vld [vmem:[%s1183_s26] ss:$8 sps:$4 sm:$0xff]  }
  0x60   : > { %v841_v15 = vld [vmem:[%s1189_s6 + $0x70] sm:$0xff]   ;;  %494 = vmatprep.mubr.bf16.mxu0 %v847_v12  ;;  %502 = vmatprep.mubr.bf16.mxu1 %v850_v13  ;;  %v843_v17 = vld [vmem:[%s1189_s6 + $0x78] sm:$0xff]   ;;  %v306_v23 = vld [vmem:[#allocation2] sm:$0xff] }
  0x61   : > { %713 = vmatpush3.bf16.msra.mxu0 %v832_v4  ;;  %747 = vmatpush3.bf16.msra.mxu1 %v832_v4  ;;  %v842_v16 = vld [vmem:[%s1189_s6 + $0x30] sm:$0xff]   ;;  %v844_v18 = vld [vmem:[%s1189_s6 + $0x38] sm:$0xff]   ;;  %v307_v31 = vld [vmem:[#allocation2 + $0x8] sm:$0xff] }
  0x62   : > { %714 = vmatprep.subr.bf16.mxu0 %v833_v5  ;;  %740 = vmatprep.subr.bf16.mxu1 %v833_v5  ;;  %v848_v20 = vld [vmem:[%s1183_s26 + $0x10] ss:$8 sps:$4 sm:$0xff]   ;;  %v701_v42 = vld [vmem:[%s1274_s2] ss:$0 sm:$0xff] (!%p700_p12) }
  0x63   : > { %v308_v25 = vld [vmem:[#allocation2 + $0x10] sm:$0xff]  ;;  %v309_v33 = vld [vmem:[#allocation2 + $0x18] sm:$0xff]  ;;  %v702_v46 = vld [vmem:[%s1275_s3] ss:$0 sm:$0xff] (!%p700_p12) }
  0x64   : > { %v703_v52 = vld [vmem:[%s1276_s4] ss:$0 sm:$0xff] (!%p700_p12) }
  0x65   : > { %715 = vmatpush3.bf16.msra.mxu0 %v834_v6  ;;  %748 = vmatpush3.bf16.msra.mxu1 %v834_v6 }
  0x66   : > { %716 = vmatprep.subr.bf16.mxu0 %v835_v7  ;;  %741 = vmatprep.subr.bf16.mxu1 %v835_v7 }
  0x69   : > { %717 = vmatpush3.bf16.msra.mxu0 %v836_v8  ;;  %749 = vmatpush3.bf16.msra.mxu1 %v836_v8 }
  0x6a   : > { %718 = vmatprep.subr.bf16.mxu0 %v837_v9  ;;  %742 = vmatprep.subr.bf16.mxu1 %v837_v9 }
  0x6d   : > { %719 = vmatpush3.bf16.msra.mxu0 %v838_v10  ;;  %750 = vmatpush3.bf16.msra.mxu1 %v838_v10 }
  0x6e   : > { %720 = vmatprep.subr.bf16.mxu0 %v839_v11  ;;  %743 = vmatprep.subr.bf16.mxu1 %v839_v11 }
  0x71   : > { %721 = vmatpush3.bf16.msra.mxu0 %v840_v14  ;;  %751 = vmatpush3.bf16.msra.mxu1 %v840_v14 }
  0x72   : > { %722 = vmatprep.subr.bf16.mxu0 %v841_v15  ;;  %744 = vmatprep.subr.bf16.mxu1 %v841_v15 }
  0x75   : > { %723 = vmatpush3.bf16.msra.mxu0 %v842_v16  ;;  %752 = vmatpush3.bf16.msra.mxu1 %v842_v16 }
  0x76   : > { %724 = vmatprep.subr.bf16.mxu0 %v843_v17  ;;  %745 = vmatprep.subr.bf16.mxu1 %v843_v17 }
  0x79   : > { %725 = vmatpush3.bf16.msra.mxu0 %v844_v18  ;;  %753 = vmatpush3.bf16.msra.mxu1 %v844_v18 }
  0x7c   : > { %495 = vmatmul.mubr.bf16.vlgmr.msra.gmra.mrb[0].mxu0 %v845_v19  ;;  %503 = vmatmul.mubr.bf16.vlgmr.msra.gmra.mrb[0].mxu1 %v848_v20 }
 0x14f   : > { %v726_v21 = vpop.f32.mrb[0].mxu0  ;;  %v732_v22 = vpop.f32.mrb[0].mxu1 }
 0x150   : > { %v727_v24 = vpop.f32.mrb[1].mxu0  ;;  %v733_v26 = vpop.f32.mrb[1].mxu1 }
 0x151   : > { %v728_v27 = vadd.f32 %v727_v24, %v726_v21  ;;  %v734_v28 = vadd.f32 %v733_v26, %v732_v22  ;;  %v729_v29 = vpop.f32.mrb[2].mxu0  ;;  %v735_v30 = vpop.f32.mrb[2].mxu1  ;;  %522 = sbr.rel (%p700_p12) target bundleno = 360 (0x168), region = 56 }
 0x152   : > { %v730_v32 = vpop.f32.mrb[3].mxu0  ;;  %v736_v34 = vpop.f32.mrb[3].mxu1 }
 0x153   : > { %v511_v35 = vadd.f32 %v728_v27, %v306_v23  ;;  %v513_v36 = vadd.f32 %v734_v28, %v308_v25  ;;  %v731_v37 = vadd.f32 %v730_v32, %v729_v29  ;;  %v737_v38 = vadd.f32 %v736_v34, %v735_v30 }
 0x155   : > { %515 = vst [vmem:[#allocation2] sm:$0xff] %v511_v35  ;;  %517 = vst [vmem:[#allocation2 + $0x10] sm:$0xff] %v513_v36  ;;  %v512_v39 = vadd.f32 %v731_v37, %v307_v31  ;;  %v514_v40 = vadd.f32 %v737_v38, %v309_v33 }
 0x157   : > { %516 = vst [vmem:[#allocation2 + $0x8] sm:$0xff] %v512_v39  ;;  %518 = vst [vmem:[#allocation2 + $0x18] sm:$0xff] %v514_v40 }
 0x15c   : > { %v523_v41 = vld [vmem:[#allocation2] sm:$0xff]  ;;  %v525_v45 = vld [vmem:[#allocation2 + $0x10] sm:$0xff] }
 0x15d   : > { %v534_v43 = vadd.f32 %v701_v42, %v523_v41  ;;  %v536_v48 = vadd.f32 %v701_v42, %v525_v45 }
 0x15e   : > { %v524_v44 = vld [vmem:[#allocation2 + $0x8] sm:$0xff]  ;;  %v526_v49 = vld [vmem:[#allocation2 + $0x18] sm:$0xff] }
 0x15f   : > { %v535_v47 = vadd.f32 %v701_v42, %v524_v44  ;;  %v538_v50 = vmax.f32 %v534_v43, 0.0  ;;  %v537_v51 = vadd.f32 %v701_v42, %v526_v49  ;;  %v540_v54 = vmax.f32 %v536_v48, 0.0 }
 0x161   : > { %v539_v53 = vmax.f32 %v535_v47, 0.0  ;;  %v549_v55 = vmul.f32 %v702_v46, %v538_v50  ;;  %v541_v56 = vmax.f32 %v537_v51, 0.0  ;;  %v551_v58 = vmul.f32 %v702_v46, %v540_v54 }
 0x163   : > { %v550_v57 = vmul.f32 %v702_v46, %v539_v53  ;;  %v560_v59 = vadd.f32 %v703_v52, %v549_v55  ;;  %v552_v60 = vmul.f32 %v702_v46, %v541_v56  ;;  %v562_v62 = vadd.f32 %v703_v52, %v551_v58 }
 0x165   : > { %v561_v61 = vadd.f32 %v703_v52, %v550_v57  ;;  %564 = vst [vmem:[#allocation8] sm:$0xff] %v560_v59  ;;  %v563_v63 = vadd.f32 %v703_v52, %v552_v60  ;;  %566 = vst [vmem:[#allocation8 + $0x10] sm:$0xff] %v562_v62 }
 0x167   : > { %565 = vst [vmem:[#allocation8 + $0x8] sm:$0xff] %v561_v61  ;;  %567 = vst [vmem:[#allocation8 + $0x18] sm:$0xff] %v563_v63 }
 0x168 PF: > { %p1228_p4 = scmp.eq.s32.totalorder %s667_s24, 2  ;;  %s1005_s7 = smov [#allocation8]  }
 0x169   : > { %s577_s9 = sshll.u32 %s1005_s7, 4  ;;  %s578_s9 = int_to_ptr.vmem [resolvable:$true] %s577_s9 }
 0x16a   : > { %s911_s13 = scalar_lea.vmem %s578_s9, 512  ;;  %p918_p0 = scmp.lt.s32.totalorder %s578_s9, %s578_s9 }
 0x16b   : > { %p912_p8 = scmp.ne.s32.totalorder %s578_s9, %s911_s13  ;;  %p919_p10 = scmp.lt.s32.totalorder %s911_s13, %s911_s13 }
 0x16d   : > { %p913_p2 = pnand %p912_p8, %p1228_p4  ;;  %p920_p5 = por %p919_p10, %p918_p0 }
 0x16f   : > { %p914_p3 = pneg %p913_p2 }
 0x171   : > { %p921_p6 = pnand %p920_p5, %p914_p3 }
 0x173   : > { %924 = shalt.err (!%p921_p6)
}
 0x174   : > { %s925_s24 = scalar_lea.hbm %s1277_s5, 512 }
 0x175   : > { %p926_p11 = scmp.ne.s32.totalorder %s1277_s5, %s925_s24  ;;  %p931_p7 = scmp.lt.u32.totalorder %s925_s24, %s1277_s5 }
 0x177   : > { %p927_p13 = pnand %p926_p11, %p1228_p4 }
 0x179   : > { %p928_p1 = pneg %p927_p13 }
 0x17b   : > { %p933_p9 = pnand %p931_p7, %p928_p1 }
 0x17d   : > { %936 = shalt.err (!%p933_p9)
}
 0x17e   : > { %s1006_s14 = smov 128   ;;  %s1007_s6 = smov 8  }
 0x17f   : > { %759 = dma.vmem_to_hbm [thread:$0]  (%p1228_p4), %s578_s9, 512, %s1277_s5, [#allocation5], %s1006_s14, %s1006_s14, %s1007_s6  }
 0x180   : > { %970 = dma.done.wait (%p1228_p4), [#allocation5], 512  }
 0x181   : > { %972 = vsyncadd (%p1228_p4), [#allocation5], 4294966784 }
 0x182 PF: > { %s22_s23 = sadd.s32 1, %s995_s23   ;;  %s1286_s18 = smov %s979_s19 }
 0x183   : > { %p19_p12 = scmp.ge.s32.totalorder %s22_s23, 5   ;;  %s1287_s19 = smov %s983_s20 }
 0x184   : > { %s1288_s20 = smov %s1089_s30  ;;  %s1289_s21 = smov %s991_s22 }
 0x185   : > { %s1290_s22 = smov %s1292_s25  ;;  %21 = sbr.rel (!%p19_p12) target bundleno = 7 (0x7), region = 99 }
 0x18c   :  { %593 = vsyncpa [#allocation4], 1 }
 0x18d   :  { %595 = vsyncpa [#allocation4 + $0x1], 1 }
 0x18e   :  { %596 = vsyncpa [#allocation7], 1 }
 0x18f   :  { %598 = vsyncpa [#allocation7 + $0x1], 1 }
 0x190   :  { %599 = vsyncpa [#allocation5], 1 }
 0x191   :  { %601 = vsyncpa [#allocation5 + $0x1], 1 }

</bundles_post_ra>
